<compile_context>
chip_gen: v7x
topology: tpu7x:2x2x1
jax: 0.10.0
libtpu: 0.0.40
codegen_flags: <defaults>
</compile_context>

<pallas_src>
import functools
import math
import re

import jax
import jax.numpy as jnp
from jax.experimental import pallas as pl
from jax.experimental.pallas import tpu as pltpu


# ----------------------------------------------------------------------------
# Kernels
# ----------------------------------------------------------------------------
def _make_single_kernel(c, n, compute_dtype):
    """One batch element per grid step, full N resident (small / medium H*W)."""
    inv_sqrt_n = 1.0 / math.sqrt(n)

    def kernel(x_ref, wqkv_ref, bqkv_ref, wln_ref, bln_ref, o_ref):
        wqkv = wqkv_ref[...].astype(compute_dtype)          # (3C, C)
        wln = wln_ref[...].astype(compute_dtype)            # (C, C)
        bqkv = bqkv_ref[...].astype(jnp.float32)            # (3C, 1)
        bln = bln_ref[...].astype(jnp.float32)              # (C, 1)

        xT = x_ref[0].astype(compute_dtype)                 # (C, N), lanes = N

        # qkv projection, channel-major: (3C, C) @ (C, N) -> (3C, N), f32 acc.
        qkvT = jnp.dot(wqkv, xT, preferred_element_type=jnp.float32) + bqkv
        qT = qkvT[0 * c:1 * c]                               # sublane-aligned
        kT = qkvT[1 * c:2 * c]
        vT = qkvT[2 * c:3 * c]

        # Center over channels (sublane axis).
        qT = qT - jnp.mean(qT, axis=0, keepdims=True)
        kT = kT - jnp.mean(kT, axis=0, keepdims=True)

        # q path: the reference's per-token 1/(q2s+1e-7) scale cancels exactly
        # in the dim=-1 L2 normalize -> skipped entirely.
        q2 = qT * qT
        q2 = q2 * jax.lax.rsqrt(jnp.maximum(
            jnp.sum(q2 * q2, axis=0, keepdims=True), 1e-24))   # (1, N)

        # k path: the per-token scale does NOT cancel (normalize is over N),
        # keep it exact.  Fold 1/sqrt(N) into the (C,1) per-channel scale
        # instead of scaling the (C,N) t2T (zero extra cost).
        k2 = kT * kT
        k2 = k2 / (jnp.sum(k2, axis=0, keepdims=True) + 1e-7)
        kscale = jax.lax.rsqrt(jnp.maximum(
            jnp.sum(k2 * k2, axis=1, keepdims=True), 1e-24)) * inv_sqrt_n
        k2 = k2 * kscale                                     # (C,N)*(C,1)

        # kvT = (k2^T @ v)^T : contract the lane (N) axis of both operands.
        # TODO(synk): inspect lowering for an inserted (C,N) relayout; if one
        # appears, restructure so the transpose lands on the (C,C) result.
        kvT = jax.lax.dot_general(
            vT.astype(compute_dtype), k2.astype(compute_dtype),
            dimension_numbers=(((1,), (1,)), ((), ())),
            preferred_element_type=jnp.float32)              # (C, C)
        t2T = jnp.dot(kvT.astype(compute_dtype), q2.astype(compute_dtype),
                      preferred_element_type=jnp.float32)    # (C, N)

        attnT = vT + t2T
        outT = jnp.dot(wln, attnT.astype(compute_dtype),
                       preferred_element_type=jnp.float32) + bln
        o_ref[0] = outT.astype(o_ref.dtype)

    return kernel


def _make_tiled_kernel(c, n, tn, compute_dtype):
    """Two-phase N-tiled path (bounded VMEM for large H*W, esp. on v7x).

    Grid = (B, phase, N // tn).  Weight/bias rows are ordered [k, v, q, v]
    (4C rows) so each phase does ONE contiguous (2C, C) @ (C, tn) projection.
    Phase 0 accumulates kvT and the per-channel k2 sum-of-squares; phase 1
    recomputes q/v per tile and writes the output.
    """
    inv_sqrt_n = 1.0 / math.sqrt(n)

    def kernel(x_ref, w_ref, b_ref, wln_ref, bln_ref, o_ref,
               kv_acc, ksq_acc, kscale_ref):
        phase = pl.program_id(1)
        t = pl.program_id(2)

        xT = x_ref[0].astype(compute_dtype)                  # (C, tn)

        @pl.when(jnp.logical_and(phase == 0, t == 0))
        def _init():
            kv_acc[...] = jnp.zeros_like(kv_acc)
            ksq_acc[...] = jnp.zeros_like(ksq_acc)

        @pl.when(phase == 0)
        def _accumulate():
            wkv = w_ref[0:2 * c].astype(compute_dtype)       # rows [k, v]
            bkv = b_ref[0:2 * c].astype(jnp.float32)
            proj = jnp.dot(wkv, xT, preferred_element_type=jnp.float32) + bkv
            kT = proj[0:c]
            vT = proj[c:2 * c]
            kT = kT - jnp.mean(kT, axis=0, keepdims=True)
            k2 = kT * kT
            k2 = k2 / (jnp.sum(k2, axis=0, keepdims=True) + 1e-7)
            ksq_acc[...] += jnp.sum(k2 * k2, axis=1, keepdims=True)  # (C,1)
            kv_acc[...] += jax.lax.dot_general(
                vT.astype(compute_dtype), k2.astype(compute_dtype),
                dimension_numbers=(((1,), (1,)), ((), ())),
                preferred_element_type=jnp.float32)          # (C_v, C_k)

        @pl.when(phase == 1)
        def _produce():
            @pl.when(t == 0)
            def _finalize():
                # Per-channel F.normalize(k2, dim=-2) scale with 1/sqrt(N)
                # folded in.  Applied on q2's contraction rows below: a natural
                # (C,1) sublane broadcast (no (1,C) relayout, no (C,N) epilogue
                # multiply).
                kscale_ref[...] = jax.lax.rsqrt(
                    jnp.maximum(ksq_acc[...], 1e-24)) * inv_sqrt_n

            wqv = w_ref[2 * c:4 * c].astype(compute_dtype)   # rows [q, v]
            bqv = b_ref[2 * c:4 * c].astype(jnp.float32)
            proj = jnp.dot(wqv, xT, preferred_element_type=jnp.float32) + bqv
            qT = proj[0:c]
            vT = proj[c:2 * c]
            qT = qT - jnp.mean(qT, axis=0, keepdims=True)
            q2 = qT * qT
            q2 = q2 * jax.lax.rsqrt(jnp.maximum(
                jnp.sum(q2 * q2, axis=0, keepdims=True), 1e-24))
            q2 = q2 * kscale_ref[...]                        # (C,tn)*(C,1)
            t2T = jnp.dot(kv_acc[...].astype(compute_dtype),
                          q2.astype(compute_dtype),
                          preferred_element_type=jnp.float32)   # (C, tn)
            attnT = vT + t2T
            wln = wln_ref[...].astype(compute_dtype)
            bln = bln_ref[...].astype(jnp.float32)
            outT = jnp.dot(wln, attnT.astype(compute_dtype),
                           preferred_element_type=jnp.float32) + bln
            o_ref[0] = outT.astype(o_ref.dtype)

    return kernel


# ----------------------------------------------------------------------------
# Generation-aware sizing
# ----------------------------------------------------------------------------
def _tpu_generation():
    try:
        kind = jax.devices()[0].device_kind
    except Exception:
        return 0
    m = re.search(r"(\d+)", kind)
    return int(m.group(1)) if m else 0


def _vmem_limit_bytes(gen):
    if gen >= 7:
        return 32 * 1024 * 1024      # v7x: 64 MiB physical VMEM per core
    if 4 <= gen <= 6:
        return 96 * 1024 * 1024      # v4/v5e/v6e: 128 MiB physical VMEM
    return None                      # unknown: keep the compiler default


def _step_bytes(c, tn, itemsize):
    io = 4 * c * tn * itemsize       # x tile + out tile, double buffered
    inter = 12 * c * tn * 4          # f32 intermediates (qkvT, q2, k2, ...)
    weights = 2 * (5 * c * c + 5 * c) * 4
    return io + inter + weights


def _pick_n_block(c, n, itemsize, vmem_limit):
    budget = (vmem_limit or (32 << 20)) // 2     # leave pipelining headroom
    if _step_bytes(c, n, itemsize) <= budget:
        return n                                  # single-pass, full N
    for k in range(n // 128, 0, -1):
        tn = k * 128
        if n % tn == 0 and _step_bytes(c, tn, itemsize) <= budget:
            return tn
    return 128


# ----------------------------------------------------------------------------
# pallas_call wrappers
# ----------------------------------------------------------------------------
@functools.partial(jax.jit,
                   static_argnames=("use_bf16", "n_block", "vmem_limit"))
def _essattn_impl(x_nchw, wqkv, bqkv, wln, bln, *, use_bf16, n_block,
                  vmem_limit):
    B, C, H, W = x_nchw.shape
    N = H * W
    x_bcn = x_nchw.reshape(B, C, N)               # free reshape, NO transpose
    compute_dtype = jnp.bfloat16 if use_bf16 else jnp.float32
    bqkv2 = bqkv.reshape(3 * C, 1)
    bln2 = bln.reshape(C, 1)

    if n_block >= N:
        out = pl.pallas_call(
            _make_single_kernel(C, N, compute_dtype),
            out_shape=jax.ShapeDtypeStruct((B, C, N), x_bcn.dtype),
            grid=(B,),
            in_specs=[
                pl.BlockSpec((1, C, N), lambda b: (b, 0, 0)),
                pl.BlockSpec((3 * C, C), lambda b: (0, 0)),
                pl.BlockSpec((3 * C, 1), lambda b: (0, 0)),
                pl.BlockSpec((C, C), lambda b: (0, 0)),
                pl.BlockSpec((C, 1), lambda b: (0, 0)),
            ],
            out_specs=pl.BlockSpec((1, C, N), lambda b: (b, 0, 0)),
            compiler_params=pltpu.CompilerParams(
                dimension_semantics=("parallel",),
                vmem_limit_bytes=vmem_limit),
        )(x_bcn, wqkv, bqkv2, wln, bln2)
    else:
        nt = N // n_block
        # Rows ordered [k, v, q, v] so each phase uses one contiguous slice.
        w4 = jnp.concatenate(
            [wqkv[C:2 * C], wqkv[2 * C:], wqkv[:C], wqkv[2 * C:]], axis=0)
        b4 = jnp.concatenate(
            [bqkv2[C:2 * C], bqkv2[2 * C:], bqkv2[:C], bqkv2[2 * C:]], axis=0)
        out = pl.pallas_call(
            _make_tiled_kernel(C, N, n_block, compute_dtype),
            out_shape=jax.ShapeDtypeStruct((B, C, N), x_bcn.dtype),
            grid=(B, 2, nt),
            in_specs=[
                pl.BlockSpec((1, C, n_block), lambda b, p, t: (b, 0, t)),
                pl.BlockSpec((4 * C, C), lambda b, p, t: (0, 0)),
                pl.BlockSpec((4 * C, 1), lambda b, p, t: (0, 0)),
                pl.BlockSpec((C, C), lambda b, p, t: (0, 0)),
                pl.BlockSpec((C, 1), lambda b, p, t: (0, 0)),
            ],
            # Phase 0 revisits block (b,0,0) without writing it; phase 1 writes
            # each tile before its block index changes, so only valid data is
            # ever copied back to HBM.
            out_specs=pl.BlockSpec((1, C, n_block),
                                   lambda b, p, t: (b, 0, p * t)),
            scratch_shapes=[
                pltpu.VMEM((C, C), jnp.float32),   # kvT accumulator
                pltpu.VMEM((C, 1), jnp.float32),   # k2 sum-of-squares
                pltpu.VMEM((C, 1), jnp.float32),   # final per-channel scale
            ],
            compiler_params=pltpu.CompilerParams(
                dimension_semantics=("parallel", "arbitrary", "arbitrary"),
                vmem_limit_bytes=vmem_limit),
        )(x_bcn, w4, b4, wln, bln2)

    # (B, C, N) -> NCHW: pure reshape (matches reshape+permute in torch).
    return out.reshape(B, C, H, W)


def essattn_pallas(x_nchw, wqkv, bqkv, wln, bln, *,
                   use_bf16_matmul=None, n_block=None):
    """ESSAttn forward.  x_nchw: (B, C, H, W); weights in PyTorch Linear
    layout: wqkv (3C, C), bqkv (3C,), wln (C, C), bln (C,).

    use_bf16_matmul=None -> bf16 MXU operands on v6e/v7x, f32 elsewhere
                            (accumulation & normalisation chain always f32).
    n_block=None         -> full-N single pass if it fits VMEM, else N-tiled.
    """
    B, C, H, W = x_nchw.shape
    N = H * W
    assert C % 8 == 0 and N % 128 == 0, "need C % 8 == 0 and H*W % 128 == 0"

    gen = _tpu_generation()
    if use_bf16_matmul is None:
        use_bf16_matmul = gen >= 6           # review: default bf16 on v6e/v7x
    vmem_limit = _vmem_limit_bytes(gen)
    if n_block is None:
        n_block = _pick_n_block(C, N, x_nchw.dtype.itemsize, vmem_limit)
    else:
        assert n_block == N or (n_block % 128 == 0 and N % n_block == 0)

    return _essattn_impl(x_nchw, wqkv, bqkv, wln, bln,
                         use_bf16=bool(use_bf16_matmul),
                         n_block=int(n_block), vmem_limit=vmem_limit)


# ----------------------------------------------------------------------------
# Pure-JAX reference (mirrors the PyTorch forward exactly)
# ----------------------------------------------------------------------------
def essattn_reference(x_nchw, wqkv, bqkv, wln, bln):
    B, C, H, W = x_nchw.shape
    N = H * W
    x = jnp.transpose(x_nchw.reshape(B, C, N), (0, 2, 1)).astype(jnp.float32)
    qkv = x @ wqkv.T + bqkv
    q, k, v = qkv[..., :C], qkv[..., C:2 * C], qkv[..., 2 * C:]
    q = q - jnp.mean(q, axis=2, keepdims=True)
    k = k - jnp.mean(k, axis=2, keepdims=True)
    q2 = q ** 2
    k2 = k ** 2
    q2s = jnp.sum(q2, axis=2, keepdims=True)
    k2s = jnp.sum(k2, axis=2, keepdims=True)
    k2 = k2 / (k2s + 1e-7)
    q2 = q2 / (q2s + 1e-7)
    k2 = k2 / jnp.maximum(
        jnp.sqrt(jnp.sum(k2 * k2, axis=-2, keepdims=True)), 1e-12)
    q2 = q2 / jnp.maximum(
        jnp.sqrt(jnp.sum(q2 * q2, axis=-1, keepdims=True)), 1e-12)
    t2 = (q2 @ (jnp.swapaxes(k2, -2, -1) @ v)) / math.sqrt(N)
    attn = v + t2
    out = attn @ wln.T + bln
    return jnp.transpose(out.reshape(B, H, W, C), (0, 3, 1, 2))


# ----------------------------------------------------------------------------
if __name__ == "__main__":
    B, C, H, W = 2, 32, 16, 16          # dim=32, N = 256
    key = jax.random.PRNGKey(0)
    kx, kw1, kb1, kw2, kb2 = jax.random.split(key, 5)

    x = jax.random.normal(kx, (B, C, H, W), dtype=jnp.float32)
    bound = 1.0 / math.sqrt(C)
    wqkv = jax.random.uniform(kw1, (3 * C, C), jnp.float32, -bound, bound)
    bqkv = jax.random.uniform(kb1, (3 * C,), jnp.float32, -bound, bound)
    wln = jax.random.uniform(kw2, (C, C), jnp.float32, -bound, bound)
    bln = jax.random.uniform(kb2, (C,), jnp.float32, -bound, bound)

    ref = essattn_reference(x, wqkv, bqkv, wln, bln)

    # 1) f32 single-pass path: strict check vs the PyTorch-equivalent ref.
    out = jax.block_until_ready(
        essattn_pallas(x, wqkv, bqkv, wln, bln, use_bf16_matmul=False))
    assert out.shape == (B, C, H, W)
    assert jnp.allclose(out, ref, atol=1e-4, rtol=1e-4), \
        f"f32 path max abs diff {jnp.max(jnp.abs(out - ref))}"

    # 2) f32 N-tiled two-phase path (forced, 2 tiles): strict check.
    out_t = jax.block_until_ready(
        essattn_pallas(x, wqkv, bqkv, wln, bln,
                       use_bf16_matmul=False, n_block=128))
    assert jnp.allclose(out_t, ref, atol=1e-4, rtol=1e-4), \
        f"tiled path max abs diff {jnp.max(jnp.abs(out_t - ref))}"

    # 3) bf16-operand / f32-accumulate fast path: looser check.
    out_bf = jax.block_until_ready(
        essattn_pallas(x, wqkv, bqkv, wln, bln, use_bf16_matmul=True))
    assert jnp.allclose(out_bf, ref, atol=5e-2, rtol=5e-2), \
        f"bf16 path max abs diff {jnp.max(jnp.abs(out_bf - ref))}"

    # 4) Generation-aware auto defaults (bf16 on v6e/v7x, f32 elsewhere).
    out_auto = jax.block_until_ready(essattn_pallas(x, wqkv, bqkv, wln, bln))
    assert jnp.allclose(out_auto, ref, atol=5e-2, rtol=5e-2), \
        f"auto path max abs diff {jnp.max(jnp.abs(out_auto - ref))}"

    print("KERNEL_OK")
</pallas_src>

<mosaic_0001>
module attributes {stable_mosaic.version = 11 : i64} {
  func.func @kernel(%arg0: i32, %arg1: memref<1x32x256xf32, #tpu.memory_space<vmem>>, %arg2: memref<96x32xf32, #tpu.memory_space<vmem>>, %arg3: memref<96x1xf32, #tpu.memory_space<vmem>>, %arg4: memref<32x32xf32, #tpu.memory_space<vmem>>, %arg5: memref<32x1xf32, #tpu.memory_space<vmem>>, %arg6: memref<1x32x256xf32, #tpu.memory_space<vmem>>) attributes {dimension_semantics = [#tpu.dimension_semantics<parallel>], iteration_bounds = array<i64: 2>, scalar_prefetch = 0 : i64, scratch_operands = 0 : i64, tpu.core_type = #tpu.core_type<tc>, window_params = [{transform_indices = @transform_0, window_bounds = array<i64: 1, 32, 256>}, {pipeline_mode = #tpu.pipeline_mode<synchronous>, transform_indices = @transform_1, window_bounds = array<i64: 96, 32>}, {pipeline_mode = #tpu.pipeline_mode<synchronous>, transform_indices = @transform_2, window_bounds = array<i64: 96, 1>}, {pipeline_mode = #tpu.pipeline_mode<synchronous>, transform_indices = @transform_3, window_bounds = array<i64: 32, 32>}, {pipeline_mode = #tpu.pipeline_mode<synchronous>, transform_indices = @transform_4, window_bounds = array<i64: 32, 1>}, {transform_indices = @transform_5, window_bounds = array<i64: 1, 32, 256>}]} {
    %c0 = arith.constant 0 : index
    %c0_0 = arith.constant 0 : index
    %0 = vector.load %arg2[%c0, %c0_0] : memref<96x32xf32, #tpu.memory_space<vmem>>, vector<96x32xf32>
    %c0_1 = arith.constant 0 : index
    %c0_2 = arith.constant 0 : index
    %1 = vector.load %arg4[%c0_1, %c0_2] : memref<32x32xf32, #tpu.memory_space<vmem>>, vector<32x32xf32>
    %c0_3 = arith.constant 0 : index
    %c0_4 = arith.constant 0 : index
    %2 = vector.load %arg3[%c0_3, %c0_4] : memref<96x1xf32, #tpu.memory_space<vmem>>, vector<96x1xf32>
    %c0_5 = arith.constant 0 : index
    %c0_6 = arith.constant 0 : index
    %3 = vector.load %arg5[%c0_5, %c0_6] : memref<32x1xf32, #tpu.memory_space<vmem>>, vector<32x1xf32>
    %c0_7 = arith.constant 0 : index
    %c0_8 = arith.constant 0 : index
    %c0_9 = arith.constant 0 : index
    %4 = vector.load %arg1[%c0_7, %c0_8, %c0_9] : memref<1x32x256xf32, #tpu.memory_space<vmem>>, vector<1x32x256xf32>
    %5 = vector.shape_cast %4 : vector<1x32x256xf32> to vector<32x256xf32>
    %cst = arith.constant dense<0.000000e+00> : vector<96x256xf32>
    %6 = tpu.matmul %0, %5, %cst {dimension_numbers = #tpu.dot_dimension_numbers<[1], [0], [0], [1], [0, 0, 1, 1], [], []>} : vector<96x32xf32>, vector<32x256xf32>, vector<96x256xf32> -> vector<96x256xf32>
    %7 = vector.broadcast %2 : vector<96x1xf32> to vector<96x256xf32>
    %8 = arith.addf %6, %7 : vector<96x256xf32>
    %9 = vector.extract_strided_slice %8 {offsets = [0, 0], sizes = [32, 256], strides = [1, 1]} : vector<96x256xf32> to vector<32x256xf32>
    %10 = vector.extract_strided_slice %8 {offsets = [32, 0], sizes = [32, 256], strides = [1, 1]} : vector<96x256xf32> to vector<32x256xf32>
    %11 = vector.extract_strided_slice %8 {offsets = [64, 0], sizes = [32, 256], strides = [1, 1]} : vector<96x256xf32> to vector<32x256xf32>
    %cst_10 = arith.constant dense<0.000000e+00> : vector<256xf32>
    %12 = vector.multi_reduction <add>, %9, %cst_10 [0] : vector<32x256xf32> to vector<256xf32>
    %13 = vector.shape_cast %12 : vector<256xf32> to vector<1x256xf32>
    %cst_11 = arith.constant 3.200000e+01 : f32
    %14 = vector.broadcast %cst_11 : f32 to vector<1x256xf32>
    %15 = arith.divf %13, %14 : vector<1x256xf32>
    %16 = vector.broadcast %15 : vector<1x256xf32> to vector<32x256xf32>
    %17 = arith.subf %9, %16 : vector<32x256xf32>
    %cst_12 = arith.constant dense<0.000000e+00> : vector<256xf32>
    %18 = vector.multi_reduction <add>, %10, %cst_12 [0] : vector<32x256xf32> to vector<256xf32>
    %19 = vector.shape_cast %18 : vector<256xf32> to vector<1x256xf32>
    %cst_13 = arith.constant 3.200000e+01 : f32
    %20 = vector.broadcast %cst_13 : f32 to vector<1x256xf32>
    %21 = arith.divf %19, %20 : vector<1x256xf32>
    %22 = vector.broadcast %21 : vector<1x256xf32> to vector<32x256xf32>
    %23 = arith.subf %10, %22 : vector<32x256xf32>
    %24 = arith.mulf %17, %17 : vector<32x256xf32>
    %25 = arith.mulf %24, %24 : vector<32x256xf32>
    %cst_14 = arith.constant dense<0.000000e+00> : vector<256xf32>
    %26 = vector.multi_reduction <add>, %25, %cst_14 [0] : vector<32x256xf32> to vector<256xf32>
    %27 = vector.shape_cast %26 : vector<256xf32> to vector<1x256xf32>
    %cst_15 = arith.constant 1.000000e-24 : f32
    %28 = vector.broadcast %cst_15 : f32 to vector<1x256xf32>
    %29 = arith.maximumf %27, %28 : vector<1x256xf32>
    %30 = math.rsqrt %29 : vector<1x256xf32>
    %31 = vector.broadcast %30 : vector<1x256xf32> to vector<32x256xf32>
    %32 = arith.mulf %24, %31 : vector<32x256xf32>
    %33 = arith.mulf %23, %23 : vector<32x256xf32>
    %cst_16 = arith.constant dense<0.000000e+00> : vector<256xf32>
    %34 = vector.multi_reduction <add>, %33, %cst_16 [0] : vector<32x256xf32> to vector<256xf32>
    %35 = vector.shape_cast %34 : vector<256xf32> to vector<1x256xf32>
    %cst_17 = arith.constant 1.000000e-07 : f32
    %36 = vector.broadcast %cst_17 : f32 to vector<1x256xf32>
    %37 = arith.addf %35, %36 : vector<1x256xf32>
    %38 = vector.broadcast %37 : vector<1x256xf32> to vector<32x256xf32>
    %39 = arith.divf %33, %38 : vector<32x256xf32>
    %40 = arith.mulf %39, %39 : vector<32x256xf32>
    %cst_18 = arith.constant dense<0.000000e+00> : vector<32xf32>
    %41 = vector.multi_reduction <add>, %40, %cst_18 [1] : vector<32x256xf32> to vector<32xf32>
    %42 = vector.shape_cast %41 : vector<32xf32> to vector<32x1xf32>
    %cst_19 = arith.constant 1.000000e-24 : f32
    %43 = vector.broadcast %cst_19 : f32 to vector<32x1xf32>
    %44 = arith.maximumf %42, %43 : vector<32x1xf32>
    %45 = math.rsqrt %44 : vector<32x1xf32>
    %cst_20 = arith.constant 6.250000e-02 : f32
    %46 = vector.broadcast %cst_20 : f32 to vector<32x1xf32>
    %47 = arith.mulf %45, %46 : vector<32x1xf32>
    %48 = vector.broadcast %47 : vector<32x1xf32> to vector<32x256xf32>
    %49 = arith.mulf %39, %48 : vector<32x256xf32>
    %cst_21 = arith.constant dense<0.000000e+00> : vector<32x32xf32>
    %50 = tpu.matmul %11, %49, %cst_21 {dimension_numbers = #tpu.dot_dimension_numbers<[1], [1], [0], [0], [0, 0, 1, 0], [], []>} : vector<32x256xf32>, vector<32x256xf32>, vector<32x32xf32> -> vector<32x32xf32>
    %cst_22 = arith.constant dense<0.000000e+00> : vector<32x256xf32>
    %51 = tpu.matmul %50, %32, %cst_22 {dimension_numbers = #tpu.dot_dimension_numbers<[1], [0], [0], [1], [0, 0, 1, 1], [], []>} : vector<32x32xf32>, vector<32x256xf32>, vector<32x256xf32> -> vector<32x256xf32>
    %52 = arith.addf %11, %51 : vector<32x256xf32>
    %cst_23 = arith.constant dense<0.000000e+00> : vector<32x256xf32>
    %53 = tpu.matmul %1, %52, %cst_23 {dimension_numbers = #tpu.dot_dimension_numbers<[1], [0], [0], [1], [0, 0, 1, 1], [], []>} : vector<32x32xf32>, vector<32x256xf32>, vector<32x256xf32> -> vector<32x256xf32>
    %54 = vector.broadcast %3 : vector<32x1xf32> to vector<32x256xf32>
    %55 = arith.addf %53, %54 : vector<32x256xf32>
    %c0_24 = arith.constant 0 : index
    %c0_25 = arith.constant 0 : index
    %c0_26 = arith.constant 0 : index
    %56 = vector.load %arg6[%c0_24, %c0_25, %c0_26] : memref<1x32x256xf32, #tpu.memory_space<vmem>>, vector<1x32x256xf32>
    %57 = vector.shape_cast %56 : vector<1x32x256xf32> to vector<32x256xf32>
    %58 = vector.shape_cast %55 : vector<32x256xf32> to vector<1x32x256xf32>
    tpu.vector_store %arg6[%c0_24, %c0_25, %c0_26], %58 {strides = array<i32>} : memref<1x32x256xf32, #tpu.memory_space<vmem>>, vector<1x32x256xf32>,
    return
  }
  func.func @transform_0(%arg0: i32) -> (i32, i32, i32) {
    %c0_i32 = arith.constant 0 : i32
    %c0_i32_0 = arith.constant 0 : i32
    %c0_i32_1 = arith.constant 0 : i32
    return %arg0, %c0_i32, %c0_i32_0 : i32, i32, i32
  }
  func.func @transform_1(%arg0: i32) -> (i32, i32) {
    %c0_i32 = arith.constant 0 : i32
    %c0_i32_0 = arith.constant 0 : i32
    %c0_i32_1 = arith.constant 0 : i32
    return %c0_i32, %c0_i32_0 : i32, i32
  }
  func.func @transform_2(%arg0: i32) -> (i32, i32) {
    %c0_i32 = arith.constant 0 : i32
    %c0_i32_0 = arith.constant 0 : i32
    %c0_i32_1 = arith.constant 0 : i32
    return %c0_i32, %c0_i32_0 : i32, i32
  }
  func.func @transform_3(%arg0: i32) -> (i32, i32) {
    %c0_i32 = arith.constant 0 : i32
    %c0_i32_0 = arith.constant 0 : i32
    %c0_i32_1 = arith.constant 0 : i32
    return %c0_i32, %c0_i32_0 : i32, i32
  }
  func.func @transform_4(%arg0: i32) -> (i32, i32) {
    %c0_i32 = arith.constant 0 : i32
    %c0_i32_0 = arith.constant 0 : i32
    %c0_i32_1 = arith.constant 0 : i32
    return %c0_i32, %c0_i32_0 : i32, i32
  }
  func.func @transform_5(%arg0: i32) -> (i32, i32, i32) {
    %c0_i32 = arith.constant 0 : i32
    %c0_i32_0 = arith.constant 0 : i32
    %c0_i32_1 = arith.constant 0 : i32
    return %arg0, %c0_i32, %c0_i32_0 : i32, i32, i32
  }
}

</mosaic_0001>

<bundles_post_ra>
// kernel: _essattn_impl.1
= control target key start
LH: loop header
LB: loop body
LE: loop exit
PB: predicated region body
PF: predicated region fallthrough
CT: control target
= control target key end

     0   :  { %s1195_s18 = smov 0   ;;  %s1481_s0 = inlined_call_operand.vmem [shape: f32[2,32,256], index: 0, kind: input, shape index: {}]   ;;  %s1482_s1 = inlined_call_operand.vmem [shape: f32[96,32], index: 1, kind: input, shape index: {}]   ;;  %s1483_s2 = inlined_call_operand.vmem [shape: f32[96,1], index: 2, kind: input, shape index: {}]   ;;  %s1484_s3 = inlined_call_operand.vmem [shape: f32[32,32], index: 3, kind: input, shape index: {}]   ;;  %s1485_s4 = inlined_call_operand.vmem [shape: f32[32,1], index: 4, kind: input, shape index: {}]   ;;  %s1486_s5 = inlined_call_operand.vmem [shape: f32[2,32,256], index: 5, kind: output, shape index: {}]  }
   0x1 LB: > { %s1058_s19 = sadd.s32 4294967295, %s1161_s18   ;;  %p1062_p0 = scmp.ge.s32.totalorder %s1161_s18, 1  ;;  %s1161_s18 = sphi %s1195_s18, %s15_s18  }
   0x2   : > { %p187_p1 = scmp.lt.s32.totalorder %s1161_s18, 3 }
   0x4   : > { %p188_p2 = pnand %p1062_p0, %p187_p1 }
   0x5   : > { %p215_p3 = scmp.lt.s32.totalorder (!%p188_p2), %s1058_s19, 1  ;;  %v1163_v0 = vmov (!%p188_p2), 0.0   ;;  %v1164_v1 = vmov (!%p188_p2), 0   ;;  %v245_v2 = vld [vmem:[%s1483_s2 + $0x20] sm:$0xff] (!%p188_p2)  ;;  %v247_v3 = vld [vmem:[%s1483_s2 + $0x30] sm:$0xff] (!%p188_p2)  ;;  %v246_v4 = vld [vmem:[%s1483_s2 + $0x28] sm:$0xff] (!%p188_p2) }
   0x6   : > { %191 = sbr.rel (%p188_p2) target bundleno = 1178 (0x49a), region = 40  ;;  %426 = vmatprep.mubr.f32.mxu0 (!%p188_p2), %v1163_v0  ;;  %1137 = vset.pattern.permute.xlu0 (!%p188_p2), %v1164_v1  ;;  %v248_v5 = vld [vmem:[%s1483_s2 + $0x38] sm:$0xff] (!%p188_p2)  ;;  %v225_v18 = vld [vmem:[%s1482_s1] sm:$0xff] (!%p188_p2)  ;;  %vm325_vm0 = vcmask (!%p188_p2), 261120   ;;  %v226_v19 = vld [vmem:[%s1482_s1 + $0x8] sm:$0xff] (!%p188_p2) }
   0x7   : > { %1138 = vset.pattern.permute.xlu1 (!%p188_p2), %v1164_v1  ;;  %287 = vperm.xlu0 (!%p188_p2), %1137, %v245_v2   ;;  %v227_v20 = vld [vmem:[%s1482_s1 + $0x10] sm:$0xff] (!%p188_p2)  ;;  %v228_v21 = vld [vmem:[%s1482_s1 + $0x18] sm:$0xff] (!%p188_p2)  ;;  %v229_v22 = vld [vmem:[%s1482_s1 + $0x20] sm:$0xff] (!%p188_p2) }
   0x8   : > { %297 = vperm.xlu1 (!%p188_p2), %1138, %v247_v3   ;;  %v230_v23 = vld [vmem:[%s1482_s1 + $0x28] sm:$0xff] (!%p188_p2)  ;;  %v231_v24 = vld [vmem:[%s1482_s1 + $0x30] sm:$0xff] (!%p188_p2)  ;;  %v232_v25 = vld [vmem:[%s1482_s1 + $0x38] sm:$0xff] (!%p188_p2) }
   0x9   : > { %v233_v26 = vld [vmem:[%s1482_s1 + $0x40] sm:$0xff] (!%p188_p2)  ;;  %v234_v27 = vld [vmem:[%s1482_s1 + $0x48] sm:$0xff] (!%p188_p2)  ;;  %v235_v28 = vld [vmem:[%s1482_s1 + $0x50] sm:$0xff] (!%p188_p2) }
   0xa   : > { %v236_v29 = vld [vmem:[%s1482_s1 + $0x58] sm:$0xff] (!%p188_p2) }
   0xb   : > { %292 = vperm.xlu0 (!%p188_p2), %1137, %v246_v4  }
   0xc   : > { %302 = vperm.xlu1 (!%p188_p2), %1138, %v248_v5  }
   0xd   : > { %s1488_s19 = smov (!%p215_p3, %s1058_s19), 1 }
   0xe   : > { %s1089_s24 = sshll.u32 %s1488_s19, 6 }
   0xf   : > { %s219_s29 = scalar_lea.vmem %s1481_s0, %s1089_s24  ;;  %s224_s23 = scalar_lea.vmem %s1486_s5, %s1089_s24 }
  0x10   : > { %v258_v6 = vld [vmem:[%s219_s29 + $0x8] sm:$0xff]  ;;  %v260_v7 = vld [vmem:[%s219_s29 + $0x18] sm:$0xff]  ;;  %v257_v8 = vld [vmem:[%s219_s29] sm:$0xff] }
  0x11   : > { %v1091_v9 = vpack.c.bf16 %v260_v7, %v258_v6  ;;  %v259_v10 = vld [vmem:[%s219_s29 + $0x10] sm:$0xff]  ;;  %v262_v11 = vld [vmem:[%s219_s29 + $0x28] sm:$0xff]  ;;  %v264_v12 = vld [vmem:[%s219_s29 + $0x38] sm:$0xff] }
  0x12   : > { %v1093_v13 = vpack.c.bf16 %v259_v10, %v257_v8  ;;  %v1095_v14 = vpack.c.bf16 %v264_v12, %v262_v11  ;;  %v261_v15 = vld [vmem:[%s219_s29 + $0x20] sm:$0xff]  ;;  %v263_v16 = vld [vmem:[%s219_s29 + $0x30] sm:$0xff] }
  0x13   : > { %1092 = vmatprep.subr.bf16.mxu0 %v1091_v9  ;;  %v1097_v17 = vpack.c.bf16 %v263_v16, %v261_v15 }
  0x14   : > { %1094 = vmatpush1.bf16.msra.mxu0 %v1093_v13 }
  0x15   : > { %1096 = vmatprep.subr.bf16.mxu0 %v1095_v14 }
  0x18   : > { %1098 = vmatpush1.bf16.msra.mxu0 %v1097_v17 }
  0x1b   : > { %1067 = vmatmul.mubr.msk.f32.vlgmr.msra.gmra.mrb[0].mxu0 %vm325_vm0, %v225_v18 }
  0x1c   : > { %432 = vmatprep.mubr.f32.mxu0 %v1163_v0 }
  0x1f   : > { %1068 = vmatmul.mubr.msk.f32.gmra.mrb[2].mxu0 %vm325_vm0, %v226_v19 }
  0x20   : > { %438 = vmatprep.mubr.f32.mxu0 %v1163_v0 }
  0x23   : > { %1069 = vmatmul.mubr.msk.f32.gmra.mrb[4].mxu0 %vm325_vm0, %v227_v20 }
  0x24   : > { %444 = vmatprep.mubr.f32.mxu0 %v1163_v0 }
  0x27   : > { %1070 = vmatmul.mubr.msk.f32.gmra.mrb[6].mxu0 %vm325_vm0, %v228_v21 }
  0x28   : > { %450 = vmatprep.mubr.f32.mxu0 %v1163_v0 }
  0x2b   : > { %1071 = vmatmul.mubr.msk.f32.gmra.mrb[8].mxu0 %vm325_vm0, %v229_v22 }
  0x2c   : > { %456 = vmatprep.mubr.f32.mxu0 %v1163_v0 }
  0x2f   : > { %1072 = vmatmul.mubr.msk.f32.gmra.mrb[10].mxu0 %vm325_vm0, %v230_v23 }
  0x30   : > { %462 = vmatprep.mubr.f32.mxu0 %v1163_v0 }
  0x33   : > { %1073 = vmatmul.mubr.msk.f32.gmra.mrb[12].mxu0 %vm325_vm0, %v231_v24 }
  0x34   : > { %468 = vmatprep.mubr.f32.mxu0 %v1163_v0 }
  0x37   : > { %1074 = vmatmul.mubr.msk.f32.gmra.mrb[14].mxu0 %vm325_vm0, %v232_v25 }
  0x38   : > { %474 = vmatprep.mubr.f32.mxu0 %v1163_v0 }
  0x3b   : > { %1075 = vmatmul.mubr.msk.f32.gmra.mrb[16].mxu0 %vm325_vm0, %v233_v26 }
  0x3c   : > { %480 = vmatprep.mubr.f32.mxu0 %v1163_v0 }
  0x3f   : > { %1076 = vmatmul.mubr.msk.f32.gmra.mrb[18].mxu0 %vm325_vm0, %v234_v27 }
  0x40   : > { %486 = vmatprep.mubr.f32.mxu0 %v1163_v0 }
  0x43   : > { %1077 = vmatmul.mubr.msk.f32.gmra.mrb[20].mxu0 %vm325_vm0, %v235_v28 }
  0x44   : > { %492 = vmatprep.mubr.f32.mxu0 %v1163_v0 }
  0x47   : > { %1078 = vmatmul.mubr.msk.f32.gmra.mrb[22].mxu0 %vm325_vm0, %v236_v29 }
  0x86   : > { %v288_v37 = vpop.permute.xlu0 %287 }
  0x87   : > { %v298_v47 = vpop.permute.xlu1 %297 }
  0x8a   : > { %v293_v41 = vpop.permute.xlu0 %292 }
  0x8b   : > { %v303_v56 = vpop.permute.xlu1 %302 }
  0xee   : > { %v1283_v30 = vpop.f32.mrb[0].mxu0 }
  0xef   : > { %v1285_v31 = vpop.f32.mrb[1].mxu0 }
  0xf2   : > { %v1287_v32 = vpop.f32.mrb[2].mxu0 }
  0xf3   : > { %v1289_v33 = vpop.f32.mrb[3].mxu0 }
  0xf6   : > { %v1291_v34 = vpop.f32.mrb[4].mxu0 }
  0xf7   : > { %v1293_v35 = vpop.f32.mrb[5].mxu0 }
  0xfa   : > { %v1295_v36 = vpop.f32.mrb[6].mxu0 }
  0xfb   : > { %v1297_v38 = vpop.f32.mrb[7].mxu0 }
  0xfe   : > { %v452_v39 = vpop.f32.mrb[8].mxu0 }
  0xff   : > { %v454_v40 = vpop.f32.mrb[9].mxu0  ;;  %v453_v43 = vadd.f32 %v452_v39, %v288_v37 }
 0x100   : > { %v455_v46 = vadd.f32 %v454_v40, %v288_v37 }
 0x102   : > { %v458_v42 = vpop.f32.mrb[10].mxu0 }
 0x103   : > { %v459_v44 = vadd.f32 %v458_v42, %v293_v41  ;;  %v460_v45 = vpop.f32.mrb[11].mxu0 }
 0x104   : > { %v461_v48 = vadd.f32 %v460_v45, %v293_v41 }
 0x105   : > { %v528_v49 = vadd.f32 %v459_v44, %v453_v43 }
 0x106   : > { %v537_v50 = vadd.f32 %v461_v48, %v455_v46  ;;  %v464_v51 = vpop.f32.mrb[12].mxu0 }
 0x107   : > { %v465_v52 = vadd.f32 %v464_v51, %v298_v47  ;;  %v466_v53 = vpop.f32.mrb[13].mxu0 }
 0x108   : > { %v467_v54 = vadd.f32 %v466_v53, %v298_v47 }
 0x109   : > { %v529_v55 = vadd.f32 %v528_v49, %v465_v52 }
 0x10a   : > { %v538_v57 = vadd.f32 %v537_v50, %v467_v54  ;;  %v470_v58 = vpop.f32.mrb[14].mxu0 }
 0x10b   : > { %v471_v59 = vadd.f32 %v470_v58, %v303_v56  ;;  %v472_v60 = vpop.f32.mrb[15].mxu0 }
 0x10c   : > { %v473_v61 = vadd.f32 %v472_v60, %v303_v56 }
 0x10d   : > { %v530_v62 = vadd.f32 %v529_v55, %v471_v59 }
 0x10e   : > { %v539_v63 = vadd.f32 %v538_v57, %v473_v61 }
 0x10f   : > { %v531_v1 = vrot.slane %v530_v62, 4 }
 0x110   : > { %v540_v2 = vrot.slane %v539_v63, 4 }
 0x111   : > { %v532_v3 = vadd.f32 %v531_v1, %v530_v62 }
 0x112   : > { %v541_v4 = vadd.f32 %v540_v2, %v539_v63 }
 0x113   : > { %v533_v5 = vrot.slane %v532_v3, 2 }
 0x114   : > { %v542_v6 = vrot.slane %v541_v4, 2 }
 0x115   : > { %v534_v7 = vadd.f32 %v533_v5, %v532_v3 }
 0x116   : > { %v543_v8 = vadd.f32 %v542_v6, %v541_v4 }
 0x117   : > { %v535_v9 = vrot.slane %v534_v7, 1 }
 0x118   : > { %v544_v10 = vrot.slane %v543_v8, 1 }
 0x119   : > { %v536_v11 = vadd.f32 %v535_v9, %v534_v7 }
 0x11a   : > { %v545_v12 = vadd.f32 %v544_v10, %v543_v8 }
 0x11b   : > { %v546_v13 = vmul.f32 0.03125, %v536_v11 }
 0x11c   : > { %v547_v14 = vmul.f32 0.03125, %v545_v12 }
 0x11d   : > { %v548_v15 = vsub.f32 %v453_v43, %v546_v13  ;;  %v550_v16 = vsub.f32 %v459_v44, %v546_v13  ;;  %v552_v17 = vsub.f32 %v465_v52, %v546_v13  ;;  %v554_v18 = vsub.f32 %v471_v59, %v546_v13 }
 0x11e   : > { %v549_v19 = vsub.f32 %v455_v46, %v547_v14  ;;  %v551_v20 = vsub.f32 %v461_v48, %v547_v14  ;;  %v553_v21 = vsub.f32 %v467_v54, %v547_v14  ;;  %v555_v22 = vsub.f32 %v473_v61, %v547_v14 }
 0x11f   : > { %v602_v23 = vmul.f32 %v548_v15, %v548_v15  ;;  %v604_v24 = vmul.f32 %v550_v16, %v550_v16  ;;  %v606_v27 = vmul.f32 %v552_v17, %v552_v17  ;;  %v608_v39 = vmul.f32 %v554_v18, %v554_v18  ;;  %v249_v18 = vld [vmem:[%s1483_s2 + $0x40] sm:$0xff] }
 0x120   : > { %v603_v25 = vmul.f32 %v549_v19, %v549_v19  ;;  %v605_v26 = vmul.f32 %v551_v20, %v551_v20  ;;  %v607_v29 = vmul.f32 %v553_v21, %v553_v21  ;;  %v609_v41 = vmul.f32 %v555_v22, %v555_v22  ;;  %v1334_v19 = vpop.f32.mrb[16].mxu0  ;;  %v251_v20 = vld [vmem:[%s1483_s2 + $0x50] sm:$0xff] }
 0x121   : > { %v610_v28 = vadd.f32 %v604_v24, %v602_v23  ;;  %v478_v21 = vpop.f32.mrb[17].mxu0 }
 0x122   : > { %v619_v37 = vadd.f32 %v605_v26, %v603_v25  ;;  %v1339_v22 = vpop.f32.mrb[18].mxu0 }
 0x123   : > { %v611_v40 = vadd.f32 %v610_v28, %v606_v27  ;;  %v242_v28 = vld [vmem:[%s1483_s2 + $0x8] sm:$0xff] }
 0x124   : > { %v620_v42 = vadd.f32 %v619_v37, %v607_v29  ;;  %v250_v37 = vld [vmem:[%s1483_s2 + $0x48] sm:$0xff] }
 0x125   : > { %v612_v43 = vadd.f32 %v611_v40, %v608_v39  ;;  %v241_v40 = vld [vmem:[%s1483_s2] sm:$0xff] }
 0x126   : > { %v621_v44 = vadd.f32 %v620_v42, %v609_v41  ;;  %v243_v42 = vld [vmem:[%s1483_s2 + $0x10] sm:$0xff] }
 0x127   : > { %v613_v45 = vrot.slane %v612_v43, 4 }
 0x128   : > { %v622_v47 = vrot.slane %v621_v44, 4 }
 0x129   : > { %v614_v46 = vadd.f32 %v613_v45, %v612_v43  ;;  %v256_v43 = vld [vmem:[%s1485_s4 + $0x18] sm:$0xff]  ;;  %v255_v45 = vld [vmem:[%s1485_s4 + $0x10] sm:$0xff] }
 0x12a   : > { %v623_v48 = vadd.f32 %v622_v47, %v621_v44  ;;  %v253_v44 = vld [vmem:[%s1485_s4] sm:$0xff] }
 0x12b   : > { %v615_v49 = vrot.slane %v614_v46, 2 }
 0x12c   : > { %v624_v50 = vrot.slane %v623_v48, 2 }
 0x12d   : > { %v616_v51 = vadd.f32 %v615_v49, %v614_v46 }
 0x12e   : > { %v625_v52 = vadd.f32 %v624_v50, %v623_v48 }
 0x12f   : > { %v617_v53 = vrot.slane %v616_v51, 1 }
 0x130   : > { %v626_v54 = vrot.slane %v625_v52, 1 }
 0x131   : > { %v618_v55 = vadd.f32 %v617_v53, %v616_v51 }
 0x132   : > { %v627_v56 = vadd.f32 %v626_v54, %v625_v52 }
 0x133   : > { %v628_v57 = vadd.f32 1e-07, %v618_v55 }
 0x134   : > { %v629_v58 = vadd.f32 1e-07, %v627_v56 }
 0x135   : > { %1139 = vrcp.f32 %v628_v57 }
 0x136   : > { %1141 = vrcp.f32 %v629_v58 }
 0x13f   : > { %v1140_v59 = vpop.eup %1139 }
 0x140   : > { %v1142_v60 = vpop.eup %1141  ;;  %v1299_v61 = vmul.f32 %v1140_v59, %v608_v39  ;;  %v1301_v62 = vmul.f32 %v1140_v59, %v604_v24  ;;  %v1303_v63 = vmul.f32 %v1140_v59, %v602_v23  ;;  %v1305_v1 = vmul.f32 %v1140_v59, %v606_v27  ;;  %v484_v23 = vpop.f32.mrb[19].mxu0  ;;  %v244_v39 = vld [vmem:[%s1483_s2 + $0x18] sm:$0xff] }
 0x141   : > { %v1307_v2 = vmul.f32 %v1142_v60, %v609_v41  ;;  %v1309_v3 = vmul.f32 %v1142_v60, %v605_v26  ;;  %v1311_v4 = vmul.f32 %v1142_v60, %v603_v25  ;;  %v1313_v5 = vmul.f32 %v1142_v60, %v607_v29  ;;  %v1341_v24 = vpop.f32.mrb[20].mxu0  ;;  %v252_v25 = vld [vmem:[%s1483_s2 + $0x58] sm:$0xff]  ;;  %v254_v41 = vld [vmem:[%s1485_s4 + $0x8] sm:$0xff] }
 0x142   : > { %v642_v6 = vmul.f32 %v1301_v62, %v1301_v62  ;;  %v640_v7 = vmul.f32 %v1303_v63, %v1303_v63  ;;  %v644_v12 = vmul.f32 %v1305_v1, %v1305_v1  ;;  %v646_v15 = vmul.f32 %v1299_v61, %v1299_v61  ;;  %v1346_v26 = vpop.f32.mrb[21].mxu0 }
 0x143   : > { %v643_v8 = vmul.f32 %v1309_v3, %v1309_v3  ;;  %v641_v9 = vmul.f32 %v1311_v4, %v1311_v4  ;;  %v645_v13 = vmul.f32 %v1313_v5, %v1313_v5  ;;  %v647_v16 = vmul.f32 %v1307_v2, %v1307_v2  ;;  %v1348_v27 = vpop.f32.mrb[22].mxu0 }
 0x144   : > { %v1353_v29 = vpop.f32.mrb[23].mxu0 }
 0x145   : > { %v651_v10 = vadd.f32 %v643_v8, %v642_v6  ;;  %v648_v11 = vadd.f32 %v641_v9, %v640_v7  ;;  %v654_v14 = vadd.f32 %v645_v13, %v644_v12  ;;  %v657_v17 = vadd.f32 %v647_v16, %v646_v15 }
 0x147   : > { %652 = vadd.xlane.f32.xlu1 %v651_v10  ;;  %649 = vadd.xlane.f32.xlu0 %v648_v11 }
 0x14b   : > { %655 = vadd.xlane.f32.xlu0 %v654_v14 }
 0x14f   : > { %658 = vadd.xlane.f32.xlu0 %v657_v17 }
 0x158   : > { %307 = vperm.xlu1 %1138, %v249_v18  }
 0x15c   : > { %317 = vperm.xlu1 %1138, %v251_v20  }
 0x160   : > { %322 = vperm.xlu1 %1138, %v252_v25  }
 0x164   : > { %272 = vperm.xlu1 %1138, %v242_v28  }
 0x165   : > { %312 = vperm.xlu0 %1137, %v250_v37  }
 0x168   : > { %282 = vperm.xlu1 %1138, %v244_v39  }
 0x169   : > { %267 = vperm.xlu0 %1137, %v241_v40  }
 0x16c   : > { %881 = vperm.xlu1 %1138, %v254_v41  }
 0x16d   : > { %277 = vperm.xlu0 %1137, %v243_v42  }
 0x170   : > { %891 = vperm.xlu1 %1138, %v256_v43  }
 0x171   : > { %876 = vperm.xlu0 %1137, %v253_v44  }
 0x175   : > { %886 = vperm.xlu0 %1137, %v255_v45  }
 0x1d4   : > { %v653_v47 = vpop.xlane.xlu1 %652  ;;  %v650_v46 = vpop.xlane.xlu0 %649 }
 0x1d5   : > { %v661_v48 = vmax.f32 %v653_v47, 1e-24  ;;  %v660_v49 = vmax.f32 %v650_v46, 1e-24 }
 0x1d7   : > { %1143 = vrsqrt.f32 %v661_v48 }
 0x1d8   : > { %1145 = vrsqrt.f32 %v660_v49  ;;  %v1379_v50 = vpop.permute.xlu1 %307  ;;  %v656_v51 = vpop.xlane.xlu0 %655 }
 0x1d9   : > { %v1382_v52 = vadd.f32 %v478_v21, %v1379_v50  ;;  %v662_v53 = vmax.f32 %v656_v51, 1e-24 }
 0x1db   : > { %1147 = vrsqrt.f32 %v662_v53  ;;  %744 = vmatprep.mubr.f32.mxu0 %v1382_v52 }
 0x1dc   : > { %v1385_v54 = vpop.permute.xlu1 %317  ;;  %v659_v55 = vpop.xlane.xlu0 %658 }
 0x1dd   : > { %v663_v56 = vmax.f32 %v659_v55, 1e-24  ;;  %v1417_v49 = vadd.f32 %v1346_v26, %v1385_v54 }
 0x1df   : > { %1149 = vrsqrt.f32 %v663_v56 }
 0x1e0   : > { %v1387_v57 = vpop.permute.xlu1 %322 }
 0x1e1   : > { %v1144_v58 = vpop.eup %1143  ;;  %v1428_v55 = vadd.f32 %v1353_v29, %v1387_v57 }
 0x1e2   : > { %v1146_v59 = vpop.eup %1145  ;;  %v669_v60 = vmul.f32 0.0625, %v1144_v58  ;;  %v1434_v58 = vadd.f32 %v1348_v27, %v1387_v57 }
 0x1e3   : > { %v668_v6 = vmul.f32 0.0625, %v1146_v59 }
 0x1e4   : > { %v674_v7 = vmul.f32 %v669_v60, %v1301_v62  ;;  %v675_v8 = vmul.f32 %v669_v60, %v1309_v3  ;;  %v313_v9 = vpop.permute.xlu0 %312  ;;  %v273_v13 = vpop.permute.xlu1 %272 }
 0x1e5   : > { %v1148_v10 = vpop.eup %1147  ;;  %v672_v11 = vmul.f32 %v668_v6, %v1303_v63  ;;  %v673_v12 = vmul.f32 %v668_v6, %v1311_v4  ;;  %v1393_v14 = vadd.f32 %v484_v23, %v313_v9  ;;  %v435_v62 = vadd.f32 %v1287_v32, %v273_v13 }
 0x1e6   : > { %v670_v15 = vmul.f32 0.0625, %v1148_v10  ;;  %v437_v63 = vadd.f32 %v1289_v33, %v273_v13 }
 0x1e7   : > { %v1099_v16 = vpack.c.bf16 %v675_v8, %v673_v12  ;;  %v1101_v17 = vpack.c.bf16 %v674_v7, %v672_v11  ;;  %749 = vmatprep.mubr.f32.mxu1 %v1393_v14 }
 0x1e8   : > { %v268_v18 = vpop.permute.xlu0 %267  ;;  %v676_v23 = vmul.f32 %v670_v15, %v1305_v1  ;;  %v677_v28 = vmul.f32 %v670_v15, %v1313_v5  ;;  %v283_v39 = vpop.permute.xlu1 %282 }
 0x1e9   : > { %v1150_v20 = vpop.eup %1149  ;;  %1100 = vmatprep.subr.bf16.mxu0 %v1099_v16  ;;  %1123 = vmatprep.subr.bf16.mxu1 %v1099_v16  ;;  %v429_v3 = vadd.f32 %v1283_v30, %v268_v18  ;;  %v431_v4 = vadd.f32 %v1285_v31, %v268_v18  ;;  %v447_v43 = vadd.f32 %v1295_v36, %v283_v39 }
 0x1ea   : > { %v671_v21 = vmul.f32 0.0625, %v1150_v20  ;;  %1102 = vmatpush1.bf16.xpose.msra.mxu0 %v1101_v17  ;;  %1125 = vmatpush1.bf16.xpose.msra.mxu1 %v1101_v17  ;;  %v449_v1 = vadd.f32 %v1297_v38, %v283_v39  ;;  %v1413_v36 = vadd.f32 %v1339_v22, %v313_v9 }
 0x1eb   : > { %v499_v25 = vadd.f32 %v435_v62, %v429_v3  ;;  %v508_v40 = vadd.f32 %v437_v63, %v431_v4 }
 0x1ec   : > { %v678_v37 = vmul.f32 %v671_v21, %v1299_v61  ;;  %v679_v32 = vmul.f32 %v671_v21, %v1307_v2  ;;  %v278_v41 = vpop.permute.xlu0 %277 }
 0x1ed   : > { %v441_v30 = vadd.f32 %v1291_v34, %v278_v41  ;;  %v443_v33 = vadd.f32 %v1293_v35, %v278_v41  ;;  %v1410_v35 = vadd.f32 %v1334_v19, %v1379_v50  ;;  %v1424_v19 = vadd.f32 %v1341_v24, %v1385_v54 }
 0x1ee   : > { %v1103_v42 = vpack.c.bf16 %v679_v32, %v677_v28  ;;  %v1105_v31 = vpack.c.bf16 %v678_v37, %v676_v23 }
 0x1ef   : > { %v500_v44 = vadd.f32 %v499_v25, %v441_v30  ;;  %v509_v45 = vadd.f32 %v508_v40, %v443_v33 }
 0x1f0   : > { %1104 = vmatprep.subr.bf16.mxu0 %v1103_v42  ;;  %1124 = vmatprep.subr.bf16.mxu1 %v1103_v42 }
 0x1f1   : > { %v501_v61 = vadd.f32 %v500_v44, %v447_v43  ;;  %v510_v5 = vadd.f32 %v509_v45, %v449_v1 }
 0x1f2   : > { %1106 = vmatpush1.bf16.xpose.msra.mxu0 %v1105_v31  ;;  %1126 = vmatpush1.bf16.xpose.msra.mxu1 %v1105_v31 }
 0x1f3   : > { %v502_v2 = vrot.slane %v501_v61, 4  ;;  %v511_v47 = vrot.slane %v510_v5, 4 }
 0x1f5   : > { %v503_v46 = vadd.f32 %v502_v2, %v501_v61  ;;  %v512_v34 = vadd.f32 %v511_v47, %v510_v5 }
 0x1f7   : > { %v504_v38 = vrot.slane %v503_v46, 2  ;;  %v513_v48 = vrot.slane %v512_v34, 2 }
 0x1f9   : > { %v505_v51 = vadd.f32 %v504_v38, %v503_v46  ;;  %v514_v53 = vadd.f32 %v513_v48, %v512_v34  ;;  %745 = vmatmul.mubr.f32.vlgmr.msra.gmra.mrb[24].mxu0 %v1410_v35  ;;  %750 = vmatmul.mubr.f32.vlgmr.msra.gmra.mrb[0].mxu1 %v1413_v36 }
 0x1fa   : > { %754 = vmatprep.mubr.f32.mxu1 %v1417_v49 }
 0x1fb   : > { %v506_v22 = vrot.slane %v505_v51, 1  ;;  %v515_v50 = vrot.slane %v514_v53, 1 }
 0x1fd   : > { %v507_v26 = vadd.f32 %v506_v22, %v505_v51  ;;  %v516_v56 = vadd.f32 %v515_v50, %v514_v53  ;;  %755 = vmatmul.mubr.f32.gmra.mrb[2].mxu1 %v1424_v19 }
 0x1fe   : > { %759 = vmatprep.mubr.f32.mxu1 %v1428_v55 }
 0x1ff   : > { %v518_v59 = vmul.f32 0.03125, %v507_v26  ;;  %v519_v60 = vmul.f32 0.03125, %v516_v56 }
 0x201   : > { %v520_v24 = vsub.f32 %v429_v3, %v518_v59  ;;  %v522_v54 = vsub.f32 %v435_v62, %v518_v59  ;;  %v524_v6 = vsub.f32 %v441_v30, %v518_v59  ;;  %v525_v7 = vsub.f32 %v443_v33, %v519_v60  ;;  %760 = vmatmul.mubr.f32.gmra.mrb[4].mxu1 %v1434_v58 }
 0x202   : > { %v526_v29 = vsub.f32 %v447_v43, %v518_v59  ;;  %v527_v8 = vsub.f32 %v449_v1, %v519_v60  ;;  %v521_v9 = vsub.f32 %v431_v4, %v519_v60  ;;  %v523_v10 = vsub.f32 %v437_v63, %v519_v60  ;;  %841 = vmatprep.mubr.f32.mxu1 %v1163_v0 }
 0x203   : > { %v556_v11 = vmul.f32 %v520_v24, %v520_v24  ;;  %v558_v12 = vmul.f32 %v522_v54, %v522_v54  ;;  %v560_v13 = vmul.f32 %v524_v6, %v524_v6  ;;  %v561_v15 = vmul.f32 %v525_v7, %v525_v7 }
 0x204   : > { %v557_v27 = vmul.f32 %v521_v9, %v521_v9  ;;  %v559_v57 = vmul.f32 %v523_v10, %v523_v10  ;;  %v562_v16 = vmul.f32 %v526_v29, %v526_v29  ;;  %v563_v20 = vmul.f32 %v527_v8, %v527_v8 }
 0x205   : > { %v564_v17 = vmul.f32 %v556_v11, %v556_v11  ;;  %v566_v18 = vmul.f32 %v558_v12, %v558_v12  ;;  %v568_v21 = vmul.f32 %v560_v13, %v560_v13  ;;  %v569_v25 = vmul.f32 %v561_v15, %v561_v15 }
 0x206   : > { %v565_v62 = vmul.f32 %v557_v27, %v557_v27  ;;  %v567_v3 = vmul.f32 %v559_v57, %v559_v57  ;;  %v570_v4 = vmul.f32 %v562_v16, %v562_v16  ;;  %v571_v37 = vmul.f32 %v563_v20, %v563_v20 }
 0x207   : > { %v572_v23 = vadd.f32 %v566_v18, %v564_v17 }
 0x208   : > { %v581_v28 = vadd.f32 %v567_v3, %v565_v62 }
 0x209   : > { %v573_v63 = vadd.f32 %v572_v23, %v568_v21 }
 0x20a   : > { %v582_v32 = vadd.f32 %v581_v28, %v569_v25 }
 0x20b   : > { %v574_v39 = vadd.f32 %v573_v63, %v570_v4 }
 0x20c   : > { %v583_v40 = vadd.f32 %v582_v32, %v571_v37 }
 0x20d   : > { %v575_v41 = vrot.slane %v574_v39, 4 }
 0x20e   : > { %v584_v30 = vrot.slane %v583_v40, 4 }
 0x20f   : > { %v576_v33 = vadd.f32 %v575_v41, %v574_v39 }
 0x210   : > { %v585_v42 = vadd.f32 %v584_v30, %v583_v40 }
 0x211   : > { %v577_v31 = vrot.slane %v576_v33, 2 }
 0x212   : > { %v586_v43 = vrot.slane %v585_v42, 2 }
 0x213   : > { %v578_v1 = vadd.f32 %v577_v31, %v576_v33  ;;  %v882_v33 = vpop.permute.xlu1 %881 }
 0x214   : > { %v587_v44 = vadd.f32 %v586_v43, %v585_v42 }
 0x215   : > { %v579_v45 = vrot.slane %v578_v1, 1 }
 0x216   : > { %v588_v61 = vrot.slane %v587_v44, 1 }
 0x217   : > { %v580_v5 = vadd.f32 %v579_v45, %v578_v1 }
 0x218   : > { %v589_v2 = vadd.f32 %v588_v61, %v587_v44 }
 0x219   : > { %v590_v47 = vmax.f32 %v580_v5, 1e-24 }
 0x21a   : > { %v591_v46 = vmax.f32 %v589_v2, 1e-24  ;;  %v892_v2 = vpop.permute.xlu1 %891 }
 0x21b   : > { %1151 = vrsqrt.f32 %v590_v47 }
 0x21c   : > { %1153 = vrsqrt.f32 %v591_v46 }
 0x225   : > { %v1152_v34 = vpop.eup %1151 }
 0x226   : > { %v1154_v38 = vpop.eup %1153  ;;  %v598_v48 = vmul.f32 %v1152_v34, %v560_v13  ;;  %v594_v51 = vmul.f32 %v1152_v34, %v556_v11  ;;  %v596_v53 = vmul.f32 %v1152_v34, %v558_v12  ;;  %v600_v22 = vmul.f32 %v1152_v34, %v562_v16 }
 0x227   : > { %v595_v50 = vmul.f32 %v1154_v38, %v557_v27  ;;  %v597_v26 = vmul.f32 %v1154_v38, %v559_v57  ;;  %v599_v56 = vmul.f32 %v1154_v38, %v561_v15  ;;  %v601_v59 = vmul.f32 %v1154_v38, %v563_v20 }
 0x228   : > { %v1109_v60 = vpack.c.bf16 %v596_v53, %v594_v51  ;;  %v1113_v24 = vpack.c.bf16 %v600_v22, %v598_v48 }
 0x229   : > { %v1107_v54 = vpack.c.bf16 %v597_v26, %v595_v50  ;;  %v1111_v6 = vpack.c.bf16 %v601_v59, %v599_v56 }
 0x22b   : > { %1108 = vmatprep.subr.bf16.mxu1 %v1107_v54 }
 0x22c   : > { %1110 = vmatpush1.bf16.msra.mxu1 %v1109_v60 }
 0x22d   : > { %1112 = vmatprep.subr.bf16.mxu1 %v1111_v6 }
 0x230   : > { %1114 = vmatpush1.bf16.msra.mxu1 %v1113_v24 }
 0x2cc   : > { %v746_v7 = vpop.f32.mrb[24].mxu0  ;;  %v751_v29 = vpop.f32.mrb[0].mxu1 }
 0x2cd   : > { %v748_v8 = vpop.f32.mrb[25].mxu0  ;;  %v753_v9 = vpop.f32.mrb[1].mxu1  ;;  %1079 = vmatmul.mubr.msk.f32.vlgmr.msra.gmra.mrb[6].mxu1 %vm325_vm0, %v746_v7 }
 0x2ce   : > { %847 = vmatprep.mubr.f32.mxu1 %v1163_v0 }
 0x2d0   : > { %v756_v10 = vpop.f32.mrb[2].mxu1 }
 0x2d1   : > { %v758_v11 = vpop.f32.mrb[3].mxu1  ;;  %1080 = vmatmul.mubr.msk.f32.gmra.mrb[8].mxu1 %vm325_vm0, %v751_v29 }
 0x2d2   : > { %853 = vmatprep.mubr.f32.mxu1 %v1163_v0 }
 0x2d4   : > { %v761_v12 = vpop.f32.mrb[4].mxu1 }
 0x2d5   : > { %v763_v13 = vpop.f32.mrb[5].mxu1  ;;  %1081 = vmatmul.mubr.msk.f32.gmra.mrb[10].mxu1 %vm325_vm0, %v756_v10 }
 0x2d6   : > { %859 = vmatprep.mubr.f32.mxu1 %v1163_v0 }
 0x2d9   : > { %1082 = vmatmul.mubr.msk.f32.gmra.mrb[12].mxu1 %vm325_vm0, %v761_v12 }
 0x2da   : > { %970 = vmatprep.mubr.f32.mxu1 %v1163_v0 }
 0x3a0   : > { %v843_v15 = vpop.f32.mrb[6].mxu1 }
 0x3a1   : > { %v845_v27 = vpop.f32.mrb[7].mxu1  ;;  %v866_v16 = vadd.f32 %v843_v15, %v1410_v35 }
 0x3a2   : > { %v867_v20 = vadd.f32 %v845_v27, %v1382_v52 }
 0x3a4   : > { %v849_v57 = vpop.f32.mrb[8].mxu1 }
 0x3a5   : > { %v868_v17 = vadd.f32 %v849_v57, %v1413_v36  ;;  %v851_v18 = vpop.f32.mrb[9].mxu1 }
 0x3a6   : > { %v869_v62 = vadd.f32 %v851_v18, %v1393_v14  ;;  %v237_v14 = vld [vmem:[%s1484_s3] sm:$0xff] }
 0x3a7   : > { %v1117_v3 = vpack.c.bf16 %v868_v17, %v866_v16 }
 0x3a8   : > { %v1115_v21 = vpack.c.bf16 %v869_v62, %v867_v20  ;;  %v855_v23 = vpop.f32.mrb[10].mxu1 }
 0x3a9   : > { %v857_v25 = vpop.f32.mrb[11].mxu1  ;;  %v870_v4 = vadd.f32 %v855_v23, %v1424_v19  ;;  %v238_v19 = vld [vmem:[%s1484_s3 + $0x8] sm:$0xff] }
 0x3aa   : > { %1116 = vmatprep.subr.bf16.mxu1 %v1115_v21  ;;  %v871_v35 = vadd.f32 %v857_v25, %v1417_v49  ;;  %v239_v49 = vld [vmem:[%s1484_s3 + $0x10] sm:$0xff] }
 0x3ab   : > { %1118 = vmatpush1.bf16.msra.mxu1 %v1117_v3 }
 0x3ac   : > { %v861_v28 = vpop.f32.mrb[12].mxu1 }
 0x3ad   : > { %v872_v63 = vadd.f32 %v861_v28, %v1434_v58  ;;  %v863_v37 = vpop.f32.mrb[13].mxu1  ;;  %v877_v58 = vpop.permute.xlu0 %876 }
 0x3ae   : > { %v873_v36 = vadd.f32 %v863_v37, %v1428_v55  ;;  %v240_v55 = vld [vmem:[%s1484_s3 + $0x18] sm:$0xff] }
 0x3af   : > { %v1121_v32 = vpack.c.bf16 %v872_v63, %v870_v4 }
 0x3b0   : > { %v1119_v52 = vpack.c.bf16 %v873_v36, %v871_v35 }
 0x3b1   : > { %v887_v1 = vpop.permute.xlu0 %886 }
 0x3b2   : > { %1120 = vmatprep.subr.bf16.mxu1 %v1119_v52 }
 0x3b3   : > { %1122 = vmatpush1.bf16.msra.mxu1 %v1121_v32 }
 0x3b6   : > { %1083 = vmatmul.mubr.msk.f32.vlgmr.msra.gmra.mrb[14].mxu1 %vm325_vm0, %v237_v14 }
 0x3b7   : > { %976 = vmatprep.mubr.f32.mxu1 %v1163_v0 }
 0x3ba   : > { %1084 = vmatmul.mubr.msk.f32.gmra.mrb[16].mxu1 %vm325_vm0, %v238_v19 }
 0x3bb   : > { %982 = vmatprep.mubr.f32.mxu1 %v1163_v0 }
 0x3be   : > { %1085 = vmatmul.mubr.msk.f32.gmra.mrb[18].mxu1 %vm325_vm0, %v239_v49 }
 0x3bf   : > { %988 = vmatprep.mubr.f32.mxu1 %v1163_v0 }
 0x3c2   : > { %1086 = vmatmul.mubr.msk.f32.gmra.mrb[20].mxu1 %vm325_vm0, %v240_v55 }
 0x489   : > { %v972_v39 = vpop.f32.mrb[14].mxu1 }
 0x48a   : > { %v973_v40 = vadd.f32 %v972_v39, %v877_v58  ;;  %v974_v41 = vpop.f32.mrb[15].mxu1 }
 0x48b   : > { %v975_v30 = vadd.f32 %v974_v41, %v877_v58 }
 0x48c   : > { %995 = vst [vmem:[%s224_s23] sm:$0xff] %v973_v40 }
 0x48d   : > { %996 = vst [vmem:[%s224_s23 + $0x8] sm:$0xff] %v975_v30  ;;  %v978_v0 = vpop.f32.mrb[16].mxu1 }
 0x48e   : > { %v979_v42 = vadd.f32 %v978_v0, %v882_v33  ;;  %v980_v31 = vpop.f32.mrb[17].mxu1 }
 0x48f   : > { %v981_v43 = vadd.f32 %v980_v31, %v882_v33 }
 0x490   : > { %997 = vst [vmem:[%s224_s23 + $0x10] sm:$0xff] %v979_v42 }
 0x491   : > { %998 = vst [vmem:[%s224_s23 + $0x18] sm:$0xff] %v981_v43  ;;  %v984_v44 = vpop.f32.mrb[18].mxu1 }
 0x492   : > { %v985_v45 = vadd.f32 %v984_v44, %v887_v1  ;;  %v986_v61 = vpop.f32.mrb[19].mxu1 }
 0x493   : > { %v987_v5 = vadd.f32 %v986_v61, %v887_v1 }
 0x494   : > { %999 = vst [vmem:[%s224_s23 + $0x20] sm:$0xff] %v985_v45 }
 0x495   : > { %1000 = vst [vmem:[%s224_s23 + $0x28] sm:$0xff] %v987_v5  ;;  %v990_v47 = vpop.f32.mrb[20].mxu1 }
 0x496   : > { %v991_v46 = vadd.f32 %v990_v47, %v892_v2  ;;  %v992_v34 = vpop.f32.mrb[21].mxu1 }
 0x497   : > { %v993_v38 = vadd.f32 %v992_v34, %v892_v2 }
 0x498   : > { %1001 = vst [vmem:[%s224_s23 + $0x30] sm:$0xff] %v991_v46 }
 0x499   : > { %1002 = vst [vmem:[%s224_s23 + $0x38] sm:$0xff] %v993_v38 }
 0x49a PF: > { %s15_s18 = sadd.s32 1, %s1161_s18  }
 0x49b   : > { %p12_p4 = scmp.ge.s32.totalorder %s15_s18, 4  }
 0x49d   :  { %14 = sbr.rel (!%p12_p4) target bundleno = 1 (0x1), region = 70 }

</bundles_post_ra>
